<compile_context>
chip_gen: v6e
topology: v6e:2x2x1
jax: 0.10.0
libtpu: 0.0.40
codegen_flags: <defaults>
</compile_context>

<pallas_src>
import jax
import jax.numpy as jnp
from jax.experimental import pallas as pl
from jax.experimental.pallas import tpu as pltpu


def attention_kernel(v_ref, qmid_ref, wvT_ref, wxT_ref, bx_ref, o_ref):
    # v_ref   : (Nb, Cv, T_HW) bf16  batch-item block, channels on sublane, HW on lane
    # qmid_ref: (Nb, M, 1)     f32   precomputed q_lin outputs (columns)
    # wvT_ref : (M, Cv)        bf16  v_conv weight (1x1 conv == matmul), pre-transposed
    # wxT_ref : (G, M)         bf16  x_conv weight, pre-transposed
    # bx_ref  : (G, 1)         f32   x_conv bias (broadcasts over HW lanes)
    # o_ref   : (Nb, G, T_HW)  f32   lane-dense output tile
    wv = wvT_ref[...]
    wx = wxT_ref[...]
    bx = bx_ref[...]
    for b in range(v_ref.shape[0]):                       # Nb is small & static
        # v_conv (no bias): bf16 x bf16 MXU matmul, f32 accumulation.
        v_mid = jnp.dot(wv, v_ref[b], preferred_element_type=jnp.float32)  # (M, T)
        # tile_2d_over_nd + add + relu in f32 (q column broadcasts over lanes).
        x = jnp.maximum(v_mid + qmid_ref[b], 0.0)                          # (M, T)
        # x_conv with bias: cast relu output to bf16 for the MXU, keep f32 acc.
        out = jnp.dot(wx, x.astype(wx.dtype),
                      preferred_element_type=jnp.float32) + bx             # (G, T)
        o_ref[b] = out.astype(o_ref.dtype)


def _vmem_capacity_bytes():
    try:
        return int(pltpu.get_tpu_info().vmem_capacity_bytes)
    except Exception:
        return 64 << 20          # conservative default (v7x per-TC size)


def _choose_tiling(n, cv, m, g, hw, in_bytes, out_bytes, act_budget_bytes):
    """Pad HW to a 128 (lane) multiple and pick (hw_pad, T_HW, num_t, Nb)."""
    hw_pad = ((hw + 127) // 128) * 128

    def tile_bytes(nb, t):
        # double-buffered v & out tiles + q_mid + f32 (M, T) intermediate headroom
        return nb * t * (2 * cv * in_bytes + 2 * g * out_bytes + 3 * m * 4) + nb * 8 * m

    t_hw, t = 128, 128
    while t <= min(hw_pad, 2048):                # >1024 shows no measured benefit
        if hw_pad % t == 0 and tile_bytes(1, t) <= act_budget_bytes:
            t_hw = t
        t += 128
    num_t = hw_pad // t_hw

    # Tiny spatial maps (e.g. VQA 14x14): batch several items per grid step to
    # amortize the ~0.35us per-step overhead; keep >= 2 grid steps so both of
    # v7x's TensorCores get work.
    nb = 1
    if num_t == 1 and hw_pad < 512 and n >= 4:
        target = max(1, 1024 // hw_pad)
        for cand in range(2, n + 1):
            if (n % cand == 0 and cand <= target and n // cand >= 2
                    and tile_bytes(cand, t_hw) <= act_budget_bytes):
                nb = cand
    return hw_pad, t_hw, num_t, nb


def attention_forward(v_nchw, q, params):
    """v_nchw: (N, Cv, H, W), q: (N, Cq) -> (N, G, H, W) float32."""
    wvT = params["wvT"].astype(jnp.bfloat16)
    wxT = params["wxT"].astype(jnp.bfloat16)
    wq, bq, bx = params["wq"], params["bq"], params["bx"]

    N, Cv, H, W = v_nchw.shape
    M = wvT.shape[0]
    G = wxT.shape[0]
    HW = H * W
    out_dtype = jnp.float32

    # NCHW -> (N, Cv, HW): pure reshape (no HBM transpose).  Feed the kernel bf16
    # so the dominant HBM read is halved.
    # TODO(synk): ideally the upstream producer emits v in bf16 so this cast
    # (an extra HBM pass) disappears entirely.
    v_flat = v_nchw.reshape(N, Cv, HW)
    if v_flat.dtype != jnp.bfloat16:
        v_flat = v_flat.astype(jnp.bfloat16)

    # Hoisted q_lin in f32 (tiny) and bias column.
    q_mid = (q.astype(jnp.float32) @ wq.astype(jnp.float32) + bq)[:, :, None]  # (N,M,1)
    bx_col = bx.astype(jnp.float32).reshape(G, 1)

    # Generation-aware VMEM budget: ~35 MiB scoped on v7x (64 MiB/TC), 64 MiB on
    # v5e/v6e (128 MiB VMEM) -> tiler picks T_HW >= 512 whenever HW allows.
    cap = _vmem_capacity_bytes()
    scoped_cap = max(min(int(cap * 0.55), 64 << 20), 16 << 20)
    w_bytes = (M * Cv + G * M) * 2 + G * 4               # bf16 weights + f32 bias
    act_budget = max(scoped_cap - 2 * w_bytes - (4 << 20), 4 << 20)

    in_b = 2                                             # bf16 v
    out_b = jnp.dtype(out_dtype).itemsize
    hw_pad, T_HW, num_t, Nb = _choose_tiling(N, Cv, M, G, HW, in_b, out_b, act_budget)

    if hw_pad != HW:
        v_flat = jnp.pad(v_flat, ((0, 0), (0, 0), (0, hw_pad - HW)))

    cost = pl.CostEstimate(
        flops=2 * N * hw_pad * M * (Cv + G),
        transcendentals=0,
        bytes_accessed=(N * Cv * hw_pad * in_b + N * M * 4 + w_bytes
                        + N * G * hw_pad * out_b))

    def call(single_buffer_weights):
        wkw = {"pipeline_mode": pl.Buffered(1)} if single_buffer_weights else {}
        return pl.pallas_call(
            attention_kernel,
            out_shape=jax.ShapeDtypeStruct((N, G, hw_pad), out_dtype),
            grid_spec=pltpu.PrefetchScalarGridSpec(
                num_scalar_prefetch=0,
                grid=(N // Nb, num_t),
                in_specs=[
                    pl.BlockSpec((Nb, Cv, T_HW), lambda n, t: (n, 0, t)),  # v tile
                    pl.BlockSpec((Nb, M, 1),     lambda n, t: (n, 0, 0)),  # q columns
                    # Resident weights/bias: constant-index blocks, single-buffered.
                    pl.BlockSpec((M, Cv), lambda n, t: (0, 0), **wkw),     # wvT
                    pl.BlockSpec((G, M),  lambda n, t: (0, 0), **wkw),     # wxT
                    pl.BlockSpec((G, 1),  lambda n, t: (0, 0), **wkw),     # bx
                ],
                out_specs=pl.BlockSpec((Nb, G, T_HW), lambda n, t: (n, 0, t)),
            ),
            compiler_params=pltpu.CompilerParams(
                dimension_semantics=("parallel", "parallel"),
                vmem_limit_bytes=int(scoped_cap)),
            cost_estimate=cost,
        )(v_flat, q_mid, wvT, wxT, bx_col)

    try:
        out_flat = jax.block_until_ready(call(True))
    except Exception:
        # Fallback if this jax build rejects pipeline_mode=pl.Buffered(1).
        out_flat = jax.block_until_ready(call(False))

    if hw_pad != HW:
        out_flat = out_flat[:, :, :HW]
    return out_flat.reshape(N, G, H, W)


def init_params(key, v_features, q_features, mid_features, glimpses):
    k = jax.random.split(key, 5)
    # Mapping from PyTorch parameters:
    #   wvT: v_conv.weight (M, Cv, 1, 1) -> reshape (M, Cv), stored bf16 (MXU operand)
    #   wq : q_lin.weight  (M, Cq)       -> transpose (Cq, M) (wrapper matmul, f32)
    #   bq : q_lin.bias    (M,)                                 f32
    #   wxT: x_conv.weight (G, M, 1, 1)  -> reshape (G, M), stored bf16 (MXU operand)
    #   bx : x_conv.bias   (G,)                                 f32
    wvT = jax.random.normal(k[0], (mid_features, v_features), jnp.float32) * 0.05
    wq = jax.random.normal(k[1], (q_features, mid_features), jnp.float32) * 0.05
    bq = jax.random.normal(k[2], (mid_features,), jnp.float32) * 0.05
    wxT = jax.random.normal(k[3], (glimpses, mid_features), jnp.float32) * 0.05
    bx = jax.random.normal(k[4], (glimpses,), jnp.float32) * 0.05
    return {"wvT": wvT.astype(jnp.bfloat16), "wq": wq, "bq": bq,
            "wxT": wxT.astype(jnp.bfloat16), "bx": bx}


def attention_reference(v_nchw, q, params):
    """Plain-JAX reference matching the PyTorch forward exactly (drop=0.0)."""
    wvT = params["wvT"].astype(jnp.float32)
    wxT = params["wxT"].astype(jnp.float32)
    wq, bq, bx = params["wq"], params["bq"], params["bx"]
    v_mid = jnp.einsum("nchw,mc->nmhw", v_nchw, wvT)              # v_conv (no bias)
    qm = q @ wq + bq                                              # q_lin
    x = jax.nn.relu(v_mid + qm[:, :, None, None])                 # tile + relu
    return jnp.einsum("nmhw,gm->nghw", x, wxT) + bx[None, :, None, None]  # x_conv


if __name__ == "__main__":
    # Small shapes consistent with the module's forward (HW = 16*16 = 256 is a lane
    # multiple so the spatial-tiling path is exercised; N=2 gives 2 grid steps).
    N, Cv, Cq, M, G, H, W = 2, 32, 16, 32, 4, 16, 16

    key = jax.random.PRNGKey(0)
    kv, kq, kp = jax.random.split(key, 3)
    v = jax.random.normal(kv, (N, Cv, H, W), jnp.float32)
    q = jax.random.normal(kq, (N, Cq), jnp.float32)
    params = init_params(kp, Cv, Cq, M, G)

    out = jax.block_until_ready(attention_forward(v, q, params))
    ref = attention_reference(v, q, params)

    assert out.shape == (N, G, H, W)
    # bf16 MXU operands (f32 accumulation) vs f32 reference -> loosened tolerance.
    assert jnp.allclose(out, ref.astype(out.dtype), atol=2e-2, rtol=2e-2), \
        "mismatch vs reference"
    print("KERNEL_OK")
</pallas_src>

<mosaic_0001>
module attributes {stable_mosaic.version = 11 : i64} {
  func.func @attention_kernel(%arg0: i32, %arg1: i32, %arg2: memref<1x32x256xbf16, #tpu.memory_space<vmem>>, %arg3: memref<1x32x1xf32, #tpu.memory_space<vmem>>, %arg4: memref<32x32xbf16, #tpu.memory_space<vmem>>, %arg5: memref<4x32xbf16, #tpu.memory_space<vmem>>, %arg6: memref<4x1xf32, #tpu.memory_space<vmem>>, %arg7: memref<1x4x256xf32, #tpu.memory_space<vmem>>) attributes {dimension_semantics = [#tpu.dimension_semantics<parallel>, #tpu.dimension_semantics<parallel>], iteration_bounds = array<i64: 2, 1>, scalar_prefetch = 0 : i64, scratch_operands = 0 : i64, tpu.core_type = #tpu.core_type<tc>, window_params = [{transform_indices = @transform_0, window_bounds = array<i64: 1, 32, 256>}, {transform_indices = @transform_1, window_bounds = array<i64: 1, 32, 1>}, {pipeline_mode = #tpu.pipeline_mode<synchronous>, transform_indices = @transform_2, window_bounds = array<i64: 32, 32>}, {pipeline_mode = #tpu.pipeline_mode<synchronous>, transform_indices = @transform_3, window_bounds = array<i64: 4, 32>}, {pipeline_mode = #tpu.pipeline_mode<synchronous>, transform_indices = @transform_4, window_bounds = array<i64: 4, 1>}, {transform_indices = @transform_5, window_bounds = array<i64: 1, 4, 256>}]} {
    %c0 = arith.constant 0 : index
    %c0_0 = arith.constant 0 : index
    %0 = vector.load %arg4[%c0, %c0_0] : memref<32x32xbf16, #tpu.memory_space<vmem>>, vector<32x32xbf16>
    %c0_1 = arith.constant 0 : index
    %c0_2 = arith.constant 0 : index
    %1 = vector.load %arg5[%c0_1, %c0_2] : memref<4x32xbf16, #tpu.memory_space<vmem>>, vector<4x32xbf16>
    %c0_3 = arith.constant 0 : index
    %c0_4 = arith.constant 0 : index
    %2 = vector.load %arg6[%c0_3, %c0_4] : memref<4x1xf32, #tpu.memory_space<vmem>>, vector<4x1xf32>
    %c0_5 = arith.constant 0 : index
    %c0_6 = arith.constant 0 : index
    %c0_7 = arith.constant 0 : index
    %3 = vector.load %arg2[%c0_5, %c0_6, %c0_7] : memref<1x32x256xbf16, #tpu.memory_space<vmem>>, vector<1x32x256xbf16>
    %4 = vector.shape_cast %3 : vector<1x32x256xbf16> to vector<32x256xbf16>
    %cst = arith.constant dense<0.000000e+00> : vector<32x256xf32>
    %5 = tpu.matmul %0, %4, %cst {dimension_numbers = #tpu.dot_dimension_numbers<[1], [0], [0], [1], [0, 0, 1, 1], [], []>} : vector<32x32xbf16>, vector<32x256xbf16>, vector<32x256xf32> -> vector<32x256xf32>
    %c0_8 = arith.constant 0 : index
    %c0_9 = arith.constant 0 : index
    %c0_10 = arith.constant 0 : index
    %6 = vector.load %arg3[%c0_8, %c0_9, %c0_10] : memref<1x32x1xf32, #tpu.memory_space<vmem>>, vector<1x32x1xf32>
    %7 = vector.shape_cast %6 : vector<1x32x1xf32> to vector<32x1xf32>
    %8 = vector.broadcast %7 : vector<32x1xf32> to vector<32x256xf32>
    %9 = arith.addf %5, %8 : vector<32x256xf32>
    %cst_11 = arith.constant 0.000000e+00 : f32
    %10 = vector.broadcast %cst_11 : f32 to vector<32x256xf32>
    %11 = arith.maximumf %9, %10 : vector<32x256xf32>
    %12 = arith.truncf %11 : vector<32x256xf32> to vector<32x256xbf16>
    %cst_12 = arith.constant dense<0.000000e+00> : vector<4x256xf32>
    %13 = tpu.matmul %1, %12, %cst_12 {dimension_numbers = #tpu.dot_dimension_numbers<[1], [0], [0], [1], [0, 0, 1, 1], [], []>} : vector<4x32xbf16>, vector<32x256xbf16>, vector<4x256xf32> -> vector<4x256xf32>
    %14 = vector.broadcast %2 : vector<4x1xf32> to vector<4x256xf32>
    %15 = arith.addf %13, %14 : vector<4x256xf32>
    %c0_13 = arith.constant 0 : index
    %c0_14 = arith.constant 0 : index
    %c0_15 = arith.constant 0 : index
    %16 = vector.load %arg7[%c0_13, %c0_14, %c0_15] : memref<1x4x256xf32, #tpu.memory_space<vmem>>, vector<1x4x256xf32>
    %17 = vector.shape_cast %16 : vector<1x4x256xf32> to vector<4x256xf32>
    %18 = vector.shape_cast %15 : vector<4x256xf32> to vector<1x4x256xf32>
    tpu.vector_store %arg7[%c0_13, %c0_14, %c0_15], %18 {strides = array<i32>} : memref<1x4x256xf32, #tpu.memory_space<vmem>>, vector<1x4x256xf32>,
    return
  }
  func.func @transform_0(%arg0: i32, %arg1: i32) -> (i32, i32, i32) {
    %c0_i32 = arith.constant 0 : i32
    %c0_i32_0 = arith.constant 0 : i32
    return %arg0, %c0_i32, %arg1 : i32, i32, i32
  }
  func.func @transform_1(%arg0: i32, %arg1: i32) -> (i32, i32, i32) {
    %c0_i32 = arith.constant 0 : i32
    %c0_i32_0 = arith.constant 0 : i32
    %c0_i32_1 = arith.constant 0 : i32
    return %arg0, %c0_i32, %c0_i32_0 : i32, i32, i32
  }
  func.func @transform_2(%arg0: i32, %arg1: i32) -> (i32, i32) {
    %c0_i32 = arith.constant 0 : i32
    %c0_i32_0 = arith.constant 0 : i32
    %c0_i32_1 = arith.constant 0 : i32
    return %c0_i32, %c0_i32_0 : i32, i32
  }
  func.func @transform_3(%arg0: i32, %arg1: i32) -> (i32, i32) {
    %c0_i32 = arith.constant 0 : i32
    %c0_i32_0 = arith.constant 0 : i32
    %c0_i32_1 = arith.constant 0 : i32
    return %c0_i32, %c0_i32_0 : i32, i32
  }
  func.func @transform_4(%arg0: i32, %arg1: i32) -> (i32, i32) {
    %c0_i32 = arith.constant 0 : i32
    %c0_i32_0 = arith.constant 0 : i32
    %c0_i32_1 = arith.constant 0 : i32
    return %c0_i32, %c0_i32_0 : i32, i32
  }
  func.func @transform_5(%arg0: i32, %arg1: i32) -> (i32, i32, i32) {
    %c0_i32 = arith.constant 0 : i32
    %c0_i32_0 = arith.constant 0 : i32
    return %arg0, %c0_i32, %arg1 : i32, i32, i32
  }
}

module attributes {stable_mosaic.version = 11 : i64} {
  func.func @attention_kernel(%arg0: i32, %arg1: i32, %arg2: memref<1x32x256xbf16, #tpu.memory_space<vmem>>, %arg3: memref<1x32x1xf32, #tpu.memory_space<vmem>>, %arg4: memref<32x32xbf16, #tpu.memory_space<vmem>>, %arg5: memref<4x32xbf16, #tpu.memory_space<vmem>>, %arg6: memref<4x1xf32, #tpu.memory_space<vmem>>, %arg7: memref<1x4x256xf32, #tpu.memory_space<vmem>>) attributes {dimension_semantics = [#tpu.dimension_semantics<parallel>, #tpu.dimension_semantics<parallel>], iteration_bounds = array<i64: 2, 1>, scalar_prefetch = 0 : i64, scratch_operands = 0 : i64, tpu.core_type = #tpu.core_type<tc>, window_params = [{transform_indices = @transform_0, window_bounds = array<i64: 1, 32, 256>}, {transform_indices = @transform_1, window_bounds = array<i64: 1, 32, 1>}, {pipeline_mode = #tpu.pipeline_mode<synchronous>, transform_indices = @transform_2, window_bounds = array<i64: 32, 32>}, {pipeline_mode = #tpu.pipeline_mode<synchronous>, transform_indices = @transform_3, window_bounds = array<i64: 4, 32>}, {pipeline_mode = #tpu.pipeline_mode<synchronous>, transform_indices = @transform_4, window_bounds = array<i64: 4, 1>}, {transform_indices = @transform_5, window_bounds = array<i64: 1, 4, 256>}]} {
    %c0 = arith.constant 0 : index
    %c0_0 = arith.constant 0 : index
    %0 = vector.load %arg4[%c0, %c0_0] : memref<32x32xbf16, #tpu.memory_space<vmem>>, vector<32x32xbf16>
    %c0_1 = arith.constant 0 : index
    %c0_2 = arith.constant 0 : index
    %1 = vector.load %arg5[%c0_1, %c0_2] : memref<4x32xbf16, #tpu.memory_space<vmem>>, vector<4x32xbf16>
    %c0_3 = arith.constant 0 : index
    %c0_4 = arith.constant 0 : index
    %2 = vector.load %arg6[%c0_3, %c0_4] : memref<4x1xf32, #tpu.memory_space<vmem>>, vector<4x1xf32>
    %c0_5 = arith.constant 0 : index
    %c0_6 = arith.constant 0 : index
    %c0_7 = arith.constant 0 : index
    %3 = vector.load %arg2[%c0_5, %c0_6, %c0_7] : memref<1x32x256xbf16, #tpu.memory_space<vmem>>, vector<1x32x256xbf16>
    %4 = vector.shape_cast %3 : vector<1x32x256xbf16> to vector<32x256xbf16>
    %cst = arith.constant dense<0.000000e+00> : vector<32x256xf32>
    %5 = tpu.matmul %0, %4, %cst {dimension_numbers = #tpu.dot_dimension_numbers<[1], [0], [0], [1], [0, 0, 1, 1], [], []>} : vector<32x32xbf16>, vector<32x256xbf16>, vector<32x256xf32> -> vector<32x256xf32>
    %c0_8 = arith.constant 0 : index
    %c0_9 = arith.constant 0 : index
    %c0_10 = arith.constant 0 : index
    %6 = vector.load %arg3[%c0_8, %c0_9, %c0_10] : memref<1x32x1xf32, #tpu.memory_space<vmem>>, vector<1x32x1xf32>
    %7 = vector.shape_cast %6 : vector<1x32x1xf32> to vector<32x1xf32>
    %8 = vector.broadcast %7 : vector<32x1xf32> to vector<32x256xf32>
    %9 = arith.addf %5, %8 : vector<32x256xf32>
    %cst_11 = arith.constant 0.000000e+00 : f32
    %10 = vector.broadcast %cst_11 : f32 to vector<32x256xf32>
    %11 = arith.maximumf %9, %10 : vector<32x256xf32>
    %12 = arith.truncf %11 : vector<32x256xf32> to vector<32x256xbf16>
    %cst_12 = arith.constant dense<0.000000e+00> : vector<4x256xf32>
    %13 = tpu.matmul %1, %12, %cst_12 {dimension_numbers = #tpu.dot_dimension_numbers<[1], [0], [0], [1], [0, 0, 1, 1], [], []>} : vector<4x32xbf16>, vector<32x256xbf16>, vector<4x256xf32> -> vector<4x256xf32>
    %14 = vector.broadcast %2 : vector<4x1xf32> to vector<4x256xf32>
    %15 = arith.addf %13, %14 : vector<4x256xf32>
    %c0_13 = arith.constant 0 : index
    %c0_14 = arith.constant 0 : index
    %c0_15 = arith.constant 0 : index
    %16 = vector.load %arg7[%c0_13, %c0_14, %c0_15] : memref<1x4x256xf32, #tpu.memory_space<vmem>>, vector<1x4x256xf32>
    %17 = vector.shape_cast %16 : vector<1x4x256xf32> to vector<4x256xf32>
    %18 = vector.shape_cast %15 : vector<4x256xf32> to vector<1x4x256xf32>
    tpu.vector_store %arg7[%c0_13, %c0_14, %c0_15], %18 {strides = array<i32>} : memref<1x4x256xf32, #tpu.memory_space<vmem>>, vector<1x4x256xf32>,
    return
  }
  func.func @transform_0(%arg0: i32, %arg1: i32) -> (i32, i32, i32) {
    %c0_i32 = arith.constant 0 : i32
    %c0_i32_0 = arith.constant 0 : i32
    return %arg0, %c0_i32, %arg1 : i32, i32, i32
  }
  func.func @transform_1(%arg0: i32, %arg1: i32) -> (i32, i32, i32) {
    %c0_i32 = arith.constant 0 : i32
    %c0_i32_0 = arith.constant 0 : i32
    %c0_i32_1 = arith.constant 0 : i32
    return %arg0, %c0_i32, %c0_i32_0 : i32, i32, i32
  }
  func.func @transform_2(%arg0: i32, %arg1: i32) -> (i32, i32) {
    %c0_i32 = arith.constant 0 : i32
    %c0_i32_0 = arith.constant 0 : i32
    %c0_i32_1 = arith.constant 0 : i32
    return %c0_i32, %c0_i32_0 : i32, i32
  }
  func.func @transform_3(%arg0: i32, %arg1: i32) -> (i32, i32) {
    %c0_i32 = arith.constant 0 : i32
    %c0_i32_0 = arith.constant 0 : i32
    %c0_i32_1 = arith.constant 0 : i32
    return %c0_i32, %c0_i32_0 : i32, i32
  }
  func.func @transform_4(%arg0: i32, %arg1: i32) -> (i32, i32) {
    %c0_i32 = arith.constant 0 : i32
    %c0_i32_0 = arith.constant 0 : i32
    %c0_i32_1 = arith.constant 0 : i32
    return %c0_i32, %c0_i32_0 : i32, i32
  }
  func.func @transform_5(%arg0: i32, %arg1: i32) -> (i32, i32, i32) {
    %c0_i32 = arith.constant 0 : i32
    %c0_i32_0 = arith.constant 0 : i32
    return %arg0, %c0_i32, %arg1 : i32, i32, i32
  }
}

</mosaic_0001>

<bundles_post_ra>
// kernel: tpu_custom_call.1
= control target key start
LH: loop header
LB: loop body
LE: loop exit
PB: predicated region body
PF: predicated region fallthrough
CT: control target
= control target key end

     0   :  { %10 = vsyncpa [#allocation3], 0  ;;  %s986_s0 = inlined_call_operand.vmem [shape: bf16[2,32,256], index: 0, kind: input, shape index: {}]   ;;  %s987_s1 = inlined_call_operand.vmem [shape: f32[2,32,1], index: 1, kind: input, shape index: {}]   ;;  %s988_s2 = inlined_call_operand.hbm [shape: bf16[32,32], index: 2, kind: input, shape index: {}]   ;;  %s989_s3 = inlined_call_operand.vmem [shape: bf16[4,32], index: 3, kind: input, shape index: {}]   ;;  %s990_s4 = inlined_call_operand.vmem [shape: f32[4,1], index: 4, kind: input, shape index: {}]   ;;  %s991_s5 = inlined_call_operand.hbm [shape: f32[2,4,256], index: 5, kind: output, shape index: {}]  }
   0x1   :  { %11 = vsyncpa [#allocation4], 0 }
   0x2   :  { %13 = vsyncpa [#allocation4 + $0x1], 0  ;;  %s848_s18 = smov 0   ;;  %s850_s19 = smov 0  }
   0x3   :  { %s852_s20 = smov 0   ;;  %s854_s21 = smov 0  }
   0x4   :  { %s856_s22 = smov 0   ;;  %s858_s23 = smov 0  }
   0x5 LB: > { %s597_s24 = sadd.s32 4294967295, %s811_s23   ;;  %s598_s25 = sadd.s32 4294967294, %s811_s23   ;;  %s811_s23 = sphi %s858_s23, %s19_s23   ;;  %s807_s22 = sphi %s856_s22, %s1000_s22   ;;  %s803_s21 = sphi %s854_s21, %s999_s21   ;;  %s799_s20 = sphi %s852_s20, %s998_s20   ;;  %s795_s19 = sphi %s850_s19, %s997_s19   ;;  %s791_s18 = sphi %s848_s18, %s996_s18  }
   0x6   : > { %s31_s26 = sadd.s32 1, %s807_s22  ;;  %s157_s27 = sadd.s32 1, %s799_s20 }
   0x7   : > { %p33_p0 = scmp.ge.s32.totalorder %s31_s26, 2  ;;  %p167_p1 = scmp.ne.s32.totalorder %s799_s20, %s795_s19 }
   0x8   : > { %p168_p2 = scmp.eq.s32.totalorder %s597_s24, 1  ;;  %p173_p3 = scmp.ne.s32.totalorder %s795_s19, %s791_s18 }
   0x9   : > { %s1002_s26 = smov (%p33_p0, %s31_s26), 0  ;;  %p174_p5 = scmp.eq.s32.totalorder %s598_s25, 1 }
   0xa   : > { %p888_p4 = por %p168_p2, %p167_p1  ;;  %s152_s29 = ssub.s32 %s807_s22, %s1002_s26 }
   0xb   : > { %p599_p6 = scmp.ge.s32.totalorder %s811_s23, 1  ;;  %p155_p7 = scmp.eq.s32.totalorder %s152_s29, 0 }
   0xc   : > { %p895_p8 = por %p174_p5, %p173_p3  ;;  %p181_p9 = scmp.lt.s32.totalorder %s811_s23, 3 }
   0xd   : > { %s901_s6 = scalar_select %p155_p7, %s799_s20, %s157_s27  }
   0xe   : > { %p903_p10 = pnand %p599_p6, %p181_p9  ;;  %p907_p11 = scmp.eq.s32.totalorder %s597_s24, 0 }
   0xf   : > { %s813_s9 = smov [#allocation2]  }
  0x10   : > { %p632_p12 = pneg %p903_p10  ;;  %s193_s10 = sshll.u32 %s813_s9, 4  ;;  %s194_s10 = int_to_ptr.vmem [resolvable:$true] %s193_s10 }
  0x11   : > { %s716_s11 = scalar_lea.vmem %s194_s10, 256  ;;  %p724_p5 = scmp.lt.s32.totalorder %s194_s10, %s194_s10 }
  0x12   : > { %p633_p13 = pnand %p907_p11, %p632_p12  ;;  %p717_p1 = scmp.ne.s32.totalorder %s194_s10, %s716_s11 }
  0x13   : > { %p725_p6 = scmp.lt.s32.totalorder %s716_s11, %s716_s11 }
  0x14   : > { %p707_p0 = pneg %p633_p13 }
  0x15   : > { %p726_p7 = por %p725_p6, %p724_p5 }
  0x16   : > { %p719_p2 = pnand %p717_p1, %p707_p0 }
  0x18   : > { %p720_p3 = pneg %p719_p2 }
  0x1a   : > { %p727_p9 = pnand %p726_p7, %p720_p3 }
  0x1c   : > { %730 = shalt.err (!%p727_p9)
}
  0x1d   : > { %s814_s12 = smov 64   ;;  %s815_s13 = smov 4  }
  0x1e   : > { %635 = dma.hbm_to_vmem [thread:$0]  (!%p633_p13), %s988_s2, 256, %s194_s10, [#allocation3], %s814_s12, %s814_s12, %s815_s13  }
  0x1f   : > { %236 = sbr.rel (%p903_p10) target bundleno = 485 (0x1e5), region = 40 }
  0x24   : > { %782 = dma.done.wait (%p907_p11), [#allocation3], 256  }
  0x25   : > { %784 = vsyncadd (%p907_p11), [#allocation3], 4294967040  ;;  %p274_p12 = scmp.lt.s32.totalorder %s803_s21, 1  ;;  %v816_v0 = vmov 0   ;;  %v703_v7 = vld [vmem:[#allocation2] sm:$0xff]   ;;  %vm354_vm0 = vcmask 261120  }
  0x26   : > { %393 = vmatprep.mubr.bf16.mxu0 %v816_v0  ;;  %696 = vset.pattern.permute.xlu1 %v816_v0  ;;  %v295_v10 = vld [vmem:[%s990_s4] sm:$0xf]  ;;  %v704_v11 = vld [vmem:[#allocation2 + $0x8] sm:$0xff]   ;;  %s270_s13 = sand.u32 1, %s795_s19   ;;  %s625_s15 = sshll.u32 %s803_s21, 7 }
  0x27   : > { %s275_s16 = scalar_select %p274_p12, %s803_s21, 1  ;;  %695 = vset.pattern.permute.xlu0 %v816_v0  ;;  %466 = vmatprep.mubr.bf16.mxu1 %v816_v0  ;;  %v294_v44 = vld [vmem:[%s989_s3] sm:$0x3] }
  0x28   : > { %s604_s14 = sshll.u32 %s270_s13, 3  ;;  %s481_s29 = scalar_lea.sflag [#allocation4], %s270_s13 }
  0x29   : > { %s623_s17 = sshll.u32 %s275_s16, 5  ;;  %s272_s16 = scalar_lea.vmem [#allocation5], %s604_s14 }
  0x2a   : > { %s281_s27 = scalar_lea.vmem %s986_s0, %s623_s17  ;;  %s287_s8 = scalar_lea.vmem %s987_s1, %s623_s17 }
  0x2b   : > { %v697_v1 = vld [vmem:[%s281_s27 + $0x14] ss:$8 sps:$4 sm:$0xff]   ;;  %v699_v2 = vld [vmem:[%s281_s27 + $0x10] ss:$8 sps:$4 sm:$0xff]   ;;  %v700_v3 = vld [vmem:[%s281_s27 + $0x4] ss:$8 sps:$4 sm:$0xff]  }
  0x2c   : > { %373 = vmatprep.subr.bf16.mxu0 %v697_v1  ;;  %v702_v4 = vld [vmem:[%s281_s27] ss:$8 sps:$4 sm:$0xff]   ;;  %v302_v6 = vld [vmem:[%s287_s8 + $0x10] sm:$0xff]  ;;  %v303_v9 = vld [vmem:[%s287_s8 + $0x18] sm:$0xff]  ;;  %s497_s17 = sshll.u32 %s272_s16, 4  ;;  %s946_s27 = scalar_lea.hbm %s991_s5, %s625_s15  ;;  %s498_s17 = int_to_ptr.vmem [resolvable:$true] %s497_s17 }
  0x2d   : > { %374 = vmatpush1.bf16.msra.mxu0 %v699_v2  ;;  %v300_v5 = vld [vmem:[%s287_s8] sm:$0xff]  ;;  %316 = vperm.xlu0 %695, %v302_v6   ;;  %v301_v8 = vld [vmem:[%s287_s8 + $0x8] sm:$0xff]  ;;  %s731_s7 = scalar_lea.vmem %s498_s17, 128  ;;  %s817_s21 = smov [#allocation5]  }
  0x2e   : > { %375 = vmatprep.subr.bf16.mxu0 %v700_v3  ;;  %306 = vperm.xlu1 %696, %v300_v5   ;;  %p732_p10 = scmp.ne.s32.totalorder %s498_s17, %s731_s7  ;;  %s735_s8 = sshll.u32 %s817_s21, 4  ;;  %s736_s8 = int_to_ptr.vmem [resolvable:$false] %s735_s8 }
  0x2f   : > { %s737_s9 = scalar_lea.vmem %s736_s8, 256  ;;  %p738_p0 = scmp.lt.s32.totalorder %s498_s17, %s736_s8 }
  0x30   : > { %p733_p11 = pnand %p732_p10, %p888_p4  ;;  %p739_p1 = scmp.lt.s32.totalorder %s737_s9, %s731_s7 }
  0x31   : > { %376 = vmatpush1.bf16.msra.mxu0 %v702_v4  ;;  %321 = vperm.xlu0 %695, %v303_v9  }
  0x32   : > { %311 = vperm.xlu1 %696, %v301_v8   ;;  %p734_p13 = pneg %p733_p11  ;;  %p740_p2 = por %p739_p1, %p738_p0 }
  0x34   : > { %615 = vmatmul.mubr.msk.bf16.vlgmr.msra.gmra.mxu0 %vm354_vm0, %v703_v7  ;;  %p741_p3 = pnand %p740_p2, %p734_p13 }
  0x35   : > { %403 = vmatprep.mubr.bf16.mxu0 %v816_v0  ;;  %428 = vperm.xlu0 %695, %v295_v10  }
  0x3c   : > { %616 = vmatmul.mubr.msk.bf16.gmra.mxu0 %vm354_vm0, %v704_v11 }
  0xa8   : > { %v317_v16 = vpop.permute.xlu0 %316 }
  0xa9   : > { %v307_v15 = vpop.permute.xlu1 %306 }
  0xac   : > { %v322_v21 = vpop.permute.xlu0 %321 }
  0xad   : > { %v312_v20 = vpop.permute.xlu1 %311 }
  0xb0   : > { %v429_v46 = vpop.permute.xlu0 %428 }
  0xf4   : > { %v395_v12 = vpop.f32.mrf.mxu0 }
  0xf5   : > { %v396_v35 = vadd.f32 %v395_v12, %v307_v15 }
  0xf6   : > { %v397_v13 = vpop.f32.mrf.mxu0 }
  0xf7   : > { %v398_v28 = vadd.f32 %v397_v13, %v307_v15  ;;  %v414_v42 = vmax.f32 %v396_v35, 0.0 }
  0xf8   : > { %v399_v14 = vpop.f32.mrf.mxu0 }
  0xf9   : > { %v400_v30 = vadd.f32 %v399_v14, %v312_v20  ;;  %v415_v37 = vmax.f32 %v398_v28, 0.0 }
  0xfa   : > { %v401_v17 = vpop.f32.mrf.mxu0 }
  0xfb   : > { %v402_v23 = vadd.f32 %v401_v17, %v312_v20  ;;  %v416_v39 = vmax.f32 %v400_v30, 0.0 }
  0xfc   : > { %v405_v18 = vpop.f32.mrf.mxu0 }
  0xfd   : > { %v406_v26 = vadd.f32 %v405_v18, %v317_v16  ;;  %v417_v32 = vmax.f32 %v402_v23, 0.0  ;;  %v422_v43 = vpack.c.bf16 %v416_v39, %v414_v42 }
  0xfe   : > { %v407_v19 = vpop.f32.mrf.mxu0 }
  0xff   : > { %v408_v24 = vadd.f32 %v407_v19, %v317_v16  ;;  %v418_v36 = vmax.f32 %v406_v26, 0.0  ;;  %v423_v41 = vpack.c.bf16 %v417_v32, %v415_v37 }
 0x100   : > { %v409_v22 = vpop.f32.mrf.mxu0 }
 0x101   : > { %v410_v25 = vadd.f32 %v409_v22, %v322_v21  ;;  %v419_v33 = vmax.f32 %v408_v24, 0.0 }
 0x102   : > { %v411_v27 = vpop.f32.mrf.mxu0 }
 0x103   : > { %v412_v29 = vadd.f32 %v411_v27, %v322_v21  ;;  %v420_v31 = vmax.f32 %v410_v25, 0.0 }
 0x105   : > { %v421_v34 = vmax.f32 %v412_v29, 0.0  ;;  %v424_v40 = vpack.c.bf16 %v420_v31, %v418_v36 }
 0x107   : > { %v425_v38 = vpack.c.bf16 %v421_v34, %v419_v33 }
 0x109   : > { %446 = vmatprep.subr.bf16.mxu1 %v425_v38 }
 0x10a   : > { %447 = vmatpush1.bf16.msra.mxu1 %v424_v40 }
 0x10b   : > { %448 = vmatprep.subr.bf16.mxu1 %v423_v41 }
 0x10e   : > { %449 = vmatpush1.bf16.msra.mxu1 %v422_v43 }
 0x111   : > { %617 = vmatmul.mubr.msk.bf16.vlgmr.msra.gmra.mxu1 %vm354_vm0, %v294_v44 }
 0x1d1   : > { %v468_v45 = vpop.f32.mrf.mxu1 }
 0x1d2   : > { %v469_v48 = vadd.f32 %v468_v45, %v429_v46 }
 0x1d3   : > { %v470_v47 = vpop.f32.mrf.mxu1 }
 0x1d4   : > { %v471_v49 = vadd.f32 %v470_v47, %v429_v46 }
 0x1d5   : > { %v472_v50 = vpop.f32.mrf.mxu1 }
 0x1d6   : > { %v477_v51 = vcombine.low %v469_v48, %v471_v49 }
 0x1d7   : > { %v473_v52 = vpop.f32.mrf.mxu1 }
 0x1d8   : > { %479 = vst [vmem:[%s272_s16] sm:$0xff] %v477_v51 }
 0x1d9   : > { %744 = shalt.err (!%p741_p3)
}
 0x1da   : > { %s745_s10 = scalar_lea.hbm %s946_s27, 128  ;;  %s749_s13 = scalar_lea.hbm %s991_s5, 256 }
 0x1db   : > { %p746_p5 = scmp.ne.s32.totalorder %s946_s27, %s745_s10  ;;  %p750_p9 = scmp.lt.s32.totalorder %s946_s27, %s991_s5 }
 0x1dc   : > { %p751_p12 = scmp.lt.s32.totalorder %s749_s13, %s745_s10 }
 0x1dd   : > { %p747_p6 = pnand %p746_p5, %p888_p4 }
 0x1de   : > { %p752_p10 = por %p751_p12, %p750_p9 }
 0x1df   : > { %p748_p7 = pneg %p747_p6 }
 0x1e1   : > { %p753_p11 = pnand %p752_p10, %p748_p7 }
 0x1e3   : > { %756 = shalt.err (!%p753_p11)
}
 0x1e4   : > { %630 = dma.vmem_to_hbm [thread:$0]  (%p888_p4), %s498_s17, 128, %s946_s27, %s481_s29  }
 0x1e5 PF: > { %p642_p13 = scmp.ge.s32.totalorder %s811_s23, 2  ;;  %s509_s16 = sand.u32 1, %s791_s18  }
 0x1e6   : > { %s510_s24 = scalar_lea.sflag [#allocation4], %s509_s16 }
 0x1e7   : > { %p637_p0 = pnand %p642_p13, %p895_p8 }
 0x1e9   : > { %p638_p1 = pneg %p637_p0 }
 0x1eb   : > { %786 = dma.done.wait (%p638_p1), %s510_s24, 128  }
 0x1ec   : > { %788 = vsyncadd (%p638_p1), %s510_s24, 4294967168  ;;  %s19_s23 = sadd.s32 1, %s811_s23   ;;  %s996_s18 = smov %s795_s19 }
 0x1ed   : > { %p16_p2 = scmp.ge.s32.totalorder %s19_s23, 4   ;;  %s997_s19 = smov %s799_s20 }
 0x1ee   : > { %s998_s20 = smov %s901_s6  ;;  %s999_s21 = smov %s807_s22 }
 0x1ef   : > { %s1000_s22 = smov %s1002_s26  ;;  %18 = sbr.rel (!%p16_p2) target bundleno = 5 (0x5), region = 83 }
 0x1f4   :  { %515 = vsyncpa [#allocation3], 1 }
 0x1f5   :  { %517 = vsyncpa [#allocation3 + $0x1], 1 }
 0x1f6   :  { %518 = vsyncpa [#allocation4], 1 }
 0x1f7   :  { %520 = vsyncpa [#allocation4 + $0x1], 1 }

// kernel: tpu_custom_call.1
= control target key start
LH: loop header
LB: loop body
LE: loop exit
PB: predicated region body
PF: predicated region fallthrough
CT: control target
= control target key end

     0   :  { %10 = vsyncpa [#allocation3], 0  ;;  %s986_s0 = inlined_call_operand.vmem [shape: bf16[2,32,256], index: 0, kind: input, shape index: {}]   ;;  %s987_s1 = inlined_call_operand.vmem [shape: f32[2,32,1], index: 1, kind: input, shape index: {}]   ;;  %s988_s2 = inlined_call_operand.hbm [shape: bf16[32,32], index: 2, kind: input, shape index: {}]   ;;  %s989_s3 = inlined_call_operand.vmem [shape: bf16[4,32], index: 3, kind: input, shape index: {}]   ;;  %s990_s4 = inlined_call_operand.vmem [shape: f32[4,1], index: 4, kind: input, shape index: {}]   ;;  %s991_s5 = inlined_call_operand.hbm [shape: f32[2,4,256], index: 5, kind: output, shape index: {}]  }
   0x1   :  { %11 = vsyncpa [#allocation4], 0 }
   0x2   :  { %13 = vsyncpa [#allocation4 + $0x1], 0  ;;  %s848_s18 = smov 0   ;;  %s850_s19 = smov 0  }
   0x3   :  { %s852_s20 = smov 0   ;;  %s854_s21 = smov 0  }
   0x4   :  { %s856_s22 = smov 0   ;;  %s858_s23 = smov 0  }
   0x5 LB: > { %s597_s24 = sadd.s32 4294967295, %s811_s23   ;;  %s598_s25 = sadd.s32 4294967294, %s811_s23   ;;  %s811_s23 = sphi %s858_s23, %s19_s23   ;;  %s807_s22 = sphi %s856_s22, %s1000_s22   ;;  %s803_s21 = sphi %s854_s21, %s999_s21   ;;  %s799_s20 = sphi %s852_s20, %s998_s20   ;;  %s795_s19 = sphi %s850_s19, %s997_s19   ;;  %s791_s18 = sphi %s848_s18, %s996_s18  }
   0x6   : > { %s31_s26 = sadd.s32 1, %s807_s22  ;;  %s157_s27 = sadd.s32 1, %s799_s20 }
   0x7   : > { %p33_p0 = scmp.ge.s32.totalorder %s31_s26, 2  ;;  %p167_p1 = scmp.ne.s32.totalorder %s799_s20, %s795_s19 }
   0x8   : > { %p168_p2 = scmp.eq.s32.totalorder %s597_s24, 1  ;;  %p173_p3 = scmp.ne.s32.totalorder %s795_s19, %s791_s18 }
   0x9   : > { %s1002_s26 = smov (%p33_p0, %s31_s26), 0  ;;  %p174_p5 = scmp.eq.s32.totalorder %s598_s25, 1 }
   0xa   : > { %p888_p4 = por %p168_p2, %p167_p1  ;;  %s152_s29 = ssub.s32 %s807_s22, %s1002_s26 }
   0xb   : > { %p599_p6 = scmp.ge.s32.totalorder %s811_s23, 1  ;;  %p155_p7 = scmp.eq.s32.totalorder %s152_s29, 0 }
   0xc   : > { %p895_p8 = por %p174_p5, %p173_p3  ;;  %p181_p9 = scmp.lt.s32.totalorder %s811_s23, 3 }
   0xd   : > { %s901_s6 = scalar_select %p155_p7, %s799_s20, %s157_s27  }
   0xe   : > { %p903_p10 = pnand %p599_p6, %p181_p9  ;;  %p907_p11 = scmp.eq.s32.totalorder %s597_s24, 0 }
   0xf   : > { %s813_s9 = smov [#allocation2]  }
  0x10   : > { %p632_p12 = pneg %p903_p10  ;;  %s193_s10 = sshll.u32 %s813_s9, 4  ;;  %s194_s10 = int_to_ptr.vmem [resolvable:$true] %s193_s10 }
  0x11   : > { %s716_s11 = scalar_lea.vmem %s194_s10, 256  ;;  %p724_p5 = scmp.lt.s32.totalorder %s194_s10, %s194_s10 }
  0x12   : > { %p633_p13 = pnand %p907_p11, %p632_p12  ;;  %p717_p1 = scmp.ne.s32.totalorder %s194_s10, %s716_s11 }
  0x13   : > { %p725_p6 = scmp.lt.s32.totalorder %s716_s11, %s716_s11 }
  0x14   : > { %p707_p0 = pneg %p633_p13 }
  0x15   : > { %p726_p7 = por %p725_p6, %p724_p5 }
  0x16   : > { %p719_p2 = pnand %p717_p1, %p707_p0 }
  0x18   : > { %p720_p3 = pneg %p719_p2 }
  0x1a   : > { %p727_p9 = pnand %p726_p7, %p720_p3 }
  0x1c   : > { %730 = shalt.err (!%p727_p9)
}
  0x1d   : > { %s814_s12 = smov 64   ;;  %s815_s13 = smov 4  }
  0x1e   : > { %635 = dma.hbm_to_vmem [thread:$0]  (!%p633_p13), %s988_s2, 256, %s194_s10, [#allocation3], %s814_s12, %s814_s12, %s815_s13  }
  0x1f   : > { %236 = sbr.rel (%p903_p10) target bundleno = 485 (0x1e5), region = 40 }
  0x24   : > { %782 = dma.done.wait (%p907_p11), [#allocation3], 256  }
  0x25   : > { %784 = vsyncadd (%p907_p11), [#allocation3], 4294967040  ;;  %p274_p12 = scmp.lt.s32.totalorder %s803_s21, 1  ;;  %v816_v0 = vmov 0   ;;  %v703_v7 = vld [vmem:[#allocation2] sm:$0xff]   ;;  %vm354_vm0 = vcmask 261120  }
  0x26   : > { %393 = vmatprep.mubr.bf16.mxu0 %v816_v0  ;;  %696 = vset.pattern.permute.xlu1 %v816_v0  ;;  %v295_v10 = vld [vmem:[%s990_s4] sm:$0xf]  ;;  %v704_v11 = vld [vmem:[#allocation2 + $0x8] sm:$0xff]   ;;  %s270_s13 = sand.u32 1, %s795_s19   ;;  %s625_s15 = sshll.u32 %s803_s21, 7 }
  0x27   : > { %s275_s16 = scalar_select %p274_p12, %s803_s21, 1  ;;  %695 = vset.pattern.permute.xlu0 %v816_v0  ;;  %466 = vmatprep.mubr.bf16.mxu1 %v816_v0  ;;  %v294_v44 = vld [vmem:[%s989_s3] sm:$0x3] }
  0x28   : > { %s604_s14 = sshll.u32 %s270_s13, 3  ;;  %s481_s29 = scalar_lea.sflag [#allocation4], %s270_s13 }
  0x29   : > { %s623_s17 = sshll.u32 %s275_s16, 5  ;;  %s272_s16 = scalar_lea.vmem [#allocation5], %s604_s14 }
  0x2a   : > { %s281_s27 = scalar_lea.vmem %s986_s0, %s623_s17  ;;  %s287_s8 = scalar_lea.vmem %s987_s1, %s623_s17 }
  0x2b   : > { %v697_v1 = vld [vmem:[%s281_s27 + $0x14] ss:$8 sps:$4 sm:$0xff]   ;;  %v699_v2 = vld [vmem:[%s281_s27 + $0x10] ss:$8 sps:$4 sm:$0xff]   ;;  %v700_v3 = vld [vmem:[%s281_s27 + $0x4] ss:$8 sps:$4 sm:$0xff]  }
  0x2c   : > { %373 = vmatprep.subr.bf16.mxu0 %v697_v1  ;;  %v702_v4 = vld [vmem:[%s281_s27] ss:$8 sps:$4 sm:$0xff]   ;;  %v302_v6 = vld [vmem:[%s287_s8 + $0x10] sm:$0xff]  ;;  %v303_v9 = vld [vmem:[%s287_s8 + $0x18] sm:$0xff]  ;;  %s497_s17 = sshll.u32 %s272_s16, 4  ;;  %s946_s27 = scalar_lea.hbm %s991_s5, %s625_s15  ;;  %s498_s17 = int_to_ptr.vmem [resolvable:$true] %s497_s17 }
  0x2d   : > { %374 = vmatpush1.bf16.msra.mxu0 %v699_v2  ;;  %v300_v5 = vld [vmem:[%s287_s8] sm:$0xff]  ;;  %316 = vperm.xlu0 %695, %v302_v6   ;;  %v301_v8 = vld [vmem:[%s287_s8 + $0x8] sm:$0xff]  ;;  %s731_s7 = scalar_lea.vmem %s498_s17, 128  ;;  %s817_s21 = smov [#allocation5]  }
  0x2e   : > { %375 = vmatprep.subr.bf16.mxu0 %v700_v3  ;;  %306 = vperm.xlu1 %696, %v300_v5   ;;  %p732_p10 = scmp.ne.s32.totalorder %s498_s17, %s731_s7  ;;  %s735_s8 = sshll.u32 %s817_s21, 4  ;;  %s736_s8 = int_to_ptr.vmem [resolvable:$false] %s735_s8 }
  0x2f   : > { %s737_s9 = scalar_lea.vmem %s736_s8, 256  ;;  %p738_p0 = scmp.lt.s32.totalorder %s498_s17, %s736_s8 }
  0x30   : > { %p733_p11 = pnand %p732_p10, %p888_p4  ;;  %p739_p1 = scmp.lt.s32.totalorder %s737_s9, %s731_s7 }
  0x31   : > { %376 = vmatpush1.bf16.msra.mxu0 %v702_v4  ;;  %321 = vperm.xlu0 %695, %v303_v9  }
  0x32   : > { %311 = vperm.xlu1 %696, %v301_v8   ;;  %p734_p13 = pneg %p733_p11  ;;  %p740_p2 = por %p739_p1, %p738_p0 }
  0x34   : > { %615 = vmatmul.mubr.msk.bf16.vlgmr.msra.gmra.mxu0 %vm354_vm0, %v703_v7  ;;  %p741_p3 = pnand %p740_p2, %p734_p13 }
  0x35   : > { %403 = vmatprep.mubr.bf16.mxu0 %v816_v0  ;;  %428 = vperm.xlu0 %695, %v295_v10  }
  0x3c   : > { %616 = vmatmul.mubr.msk.bf16.gmra.mxu0 %vm354_vm0, %v704_v11 }
  0xa8   : > { %v317_v16 = vpop.permute.xlu0 %316 }
  0xa9   : > { %v307_v15 = vpop.permute.xlu1 %306 }
  0xac   : > { %v322_v21 = vpop.permute.xlu0 %321 }
  0xad   : > { %v312_v20 = vpop.permute.xlu1 %311 }
  0xb0   : > { %v429_v46 = vpop.permute.xlu0 %428 }
  0xf4   : > { %v395_v12 = vpop.f32.mrf.mxu0 }
  0xf5   : > { %v396_v35 = vadd.f32 %v395_v12, %v307_v15 }
  0xf6   : > { %v397_v13 = vpop.f32.mrf.mxu0 }
  0xf7   : > { %v398_v28 = vadd.f32 %v397_v13, %v307_v15  ;;  %v414_v42 = vmax.f32 %v396_v35, 0.0 }
  0xf8   : > { %v399_v14 = vpop.f32.mrf.mxu0 }
  0xf9   : > { %v400_v30 = vadd.f32 %v399_v14, %v312_v20  ;;  %v415_v37 = vmax.f32 %v398_v28, 0.0 }
  0xfa   : > { %v401_v17 = vpop.f32.mrf.mxu0 }
  0xfb   : > { %v402_v23 = vadd.f32 %v401_v17, %v312_v20  ;;  %v416_v39 = vmax.f32 %v400_v30, 0.0 }
  0xfc   : > { %v405_v18 = vpop.f32.mrf.mxu0 }
  0xfd   : > { %v406_v26 = vadd.f32 %v405_v18, %v317_v16  ;;  %v417_v32 = vmax.f32 %v402_v23, 0.0  ;;  %v422_v43 = vpack.c.bf16 %v416_v39, %v414_v42 }
  0xfe   : > { %v407_v19 = vpop.f32.mrf.mxu0 }
  0xff   : > { %v408_v24 = vadd.f32 %v407_v19, %v317_v16  ;;  %v418_v36 = vmax.f32 %v406_v26, 0.0  ;;  %v423_v41 = vpack.c.bf16 %v417_v32, %v415_v37 }
 0x100   : > { %v409_v22 = vpop.f32.mrf.mxu0 }
 0x101   : > { %v410_v25 = vadd.f32 %v409_v22, %v322_v21  ;;  %v419_v33 = vmax.f32 %v408_v24, 0.0 }
 0x102   : > { %v411_v27 = vpop.f32.mrf.mxu0 }
 0x103   : > { %v412_v29 = vadd.f32 %v411_v27, %v322_v21  ;;  %v420_v31 = vmax.f32 %v410_v25, 0.0 }
 0x105   : > { %v421_v34 = vmax.f32 %v412_v29, 0.0  ;;  %v424_v40 = vpack.c.bf16 %v420_v31, %v418_v36 }
 0x107   : > { %v425_v38 = vpack.c.bf16 %v421_v34, %v419_v33 }
 0x109   : > { %446 = vmatprep.subr.bf16.mxu1 %v425_v38 }
 0x10a   : > { %447 = vmatpush1.bf16.msra.mxu1 %v424_v40 }
 0x10b   : > { %448 = vmatprep.subr.bf16.mxu1 %v423_v41 }
 0x10e   : > { %449 = vmatpush1.bf16.msra.mxu1 %v422_v43 }
 0x111   : > { %617 = vmatmul.mubr.msk.bf16.vlgmr.msra.gmra.mxu1 %vm354_vm0, %v294_v44 }
 0x1d1   : > { %v468_v45 = vpop.f32.mrf.mxu1 }
 0x1d2   : > { %v469_v48 = vadd.f32 %v468_v45, %v429_v46 }
 0x1d3   : > { %v470_v47 = vpop.f32.mrf.mxu1 }
 0x1d4   : > { %v471_v49 = vadd.f32 %v470_v47, %v429_v46 }
 0x1d5   : > { %v472_v50 = vpop.f32.mrf.mxu1 }
 0x1d6   : > { %v477_v51 = vcombine.low %v469_v48, %v471_v49 }
 0x1d7   : > { %v473_v52 = vpop.f32.mrf.mxu1 }
 0x1d8   : > { %479 = vst [vmem:[%s272_s16] sm:$0xff] %v477_v51 }
 0x1d9   : > { %744 = shalt.err (!%p741_p3)
}
 0x1da   : > { %s745_s10 = scalar_lea.hbm %s946_s27, 128  ;;  %s749_s13 = scalar_lea.hbm %s991_s5, 256 }
 0x1db   : > { %p746_p5 = scmp.ne.s32.totalorder %s946_s27, %s745_s10  ;;  %p750_p9 = scmp.lt.s32.totalorder %s946_s27, %s991_s5 }
 0x1dc   : > { %p751_p12 = scmp.lt.s32.totalorder %s749_s13, %s745_s10 }
 0x1dd   : > { %p747_p6 = pnand %p746_p5, %p888_p4 }
 0x1de   : > { %p752_p10 = por %p751_p12, %p750_p9 }
 0x1df   : > { %p748_p7 = pneg %p747_p6 }
 0x1e1   : > { %p753_p11 = pnand %p752_p10, %p748_p7 }
 0x1e3   : > { %756 = shalt.err (!%p753_p11)
}
 0x1e4   : > { %630 = dma.vmem_to_hbm [thread:$0]  (%p888_p4), %s498_s17, 128, %s946_s27, %s481_s29  }
 0x1e5 PF: > { %p642_p13 = scmp.ge.s32.totalorder %s811_s23, 2  ;;  %s509_s16 = sand.u32 1, %s791_s18  }
 0x1e6   : > { %s510_s24 = scalar_lea.sflag [#allocation4], %s509_s16 }
 0x1e7   : > { %p637_p0 = pnand %p642_p13, %p895_p8 }
 0x1e9   : > { %p638_p1 = pneg %p637_p0 }
 0x1eb   : > { %786 = dma.done.wait (%p638_p1), %s510_s24, 128  }
 0x1ec   : > { %788 = vsyncadd (%p638_p1), %s510_s24, 4294967168  ;;  %s19_s23 = sadd.s32 1, %s811_s23   ;;  %s996_s18 = smov %s795_s19 }
 0x1ed   : > { %p16_p2 = scmp.ge.s32.totalorder %s19_s23, 4   ;;  %s997_s19 = smov %s799_s20 }
 0x1ee   : > { %s998_s20 = smov %s901_s6  ;;  %s999_s21 = smov %s807_s22 }
 0x1ef   : > { %s1000_s22 = smov %s1002_s26  ;;  %18 = sbr.rel (!%p16_p2) target bundleno = 5 (0x5), region = 83 }
 0x1f4   :  { %515 = vsyncpa [#allocation3], 1 }
 0x1f5   :  { %517 = vsyncpa [#allocation3 + $0x1], 1 }
 0x1f6   :  { %518 = vsyncpa [#allocation4], 1 }
 0x1f7   :  { %520 = vsyncpa [#allocation4 + $0x1], 1 }

</bundles_post_ra>
